<compile_context>
chip_gen: v6e
topology: v6e:2x2x1
jax: 0.10.0
libtpu: 0.0.40
codegen_flags: <defaults>
</compile_context>

<pallas_src>
import jax
import jax.numpy as jnp
from jax.experimental import pallas as pl
from jax.experimental.pallas import tpu as pltpu

NUM_EMBED = 6
NUM_DICE = 5
EMBED_DIM = NUM_DICE                  # embedding_dim == num_dice in __init__
IN_DIM = NUM_DICE * EMBED_DIM + 1     # 26
OUT_DIM = 2 * NUM_DICE                # 10
X_COLS = NUM_DICE + 1                 # 6 int32 columns: 5 dice + rolls-left

K_ONEHOT = NUM_DICE * NUM_EMBED       # 30 one-hot lanes: die d shows value v
K_LAST = K_ONEHOT                     # lane 30 carries the raw rolls-left value
K_ONE = K_ONEHOT + 1                  # lane 31 is constant 1 (carries bias b1)
K_PAD = 32                            # fused first-layer K

LANE = 128                            # hidden padded to one lane tile
TILE_ALIGN = 128                      # batch-tile row alignment (multiple of 8)


def _round_up(x, m):
    return (x + m - 1) // m * m


def _mlp_kernel(x_ref, w1_ref, w2_ref, b2_ref, out_ref):
    """Fused (one-hot embed + Linear1 + bias) -> ReLU -> Linear2 (+ bias)."""
    bt = x_ref.shape[0]
    x = x_ref[...]                                           # (bt, 6) int32
    dice = x[:, :NUM_DICE]                                   # (bt, 5)
    last = x[:, NUM_DICE:X_COLS].astype(jnp.float32)         # (bt, 1)

    # Build the (bt, 32) fused feature block on the VPU:
    #   lanes 0..29 : one-hot (die d showing value v) at lane d*6 + (v-1)
    #   lane  30    : rolls-left value
    #   lane  31    : constant 1 (picks up bias b1 from the folded weights)
    lane = jax.lax.broadcasted_iota(jnp.int32, (bt, K_PAD), 1)
    feat = jnp.where(lane == K_LAST, last, 0.0)
    feat = jnp.where(lane == K_ONE, 1.0, feat)
    for d in range(NUM_DICE):
        code_d = dice[:, d:d + 1] - 1 + d * NUM_EMBED        # (bt, 1)
        feat = feat + (lane == code_d).astype(jnp.float32)

    # Layer 1 (embedding, last-roll weight and b1 all folded into w1) + ReLU.
    h = jnp.dot(feat, w1_ref[...], preferred_element_type=jnp.float32)
    h = jnp.maximum(h, 0.0)                                  # (bt, HP)

    # Layer 2: narrow (10-lane) output block, so HBM writeback is 40 B/row.
    out = jnp.dot(h, w2_ref[...], preferred_element_type=jnp.float32)
    out = out + b2_ref[...]                                  # (bt, 10)
    out_ref[...] = out.astype(out_ref.dtype)


def fold_params(params):
    """Fold embedding / last-roll weight / b1 into one (32, HP) matrix."""
    embed, w1, b1, w2, b2 = (params["embed"], params["w1"], params["b1"],
                             params["w2"], params["b2"])
    hidden = w1.shape[1]
    hp = _round_up(hidden, LANE)

    # W1_folded[d*6 + v, h] = sum_e embed[v, e] * w1[d*EMBED_DIM + e, h]
    w1_dice = w1[:NUM_DICE * EMBED_DIM].reshape(NUM_DICE, EMBED_DIM, hidden)
    w_emb = jnp.einsum("ve,deh->dvh", embed, w1_dice).reshape(K_ONEHOT, hidden)

    w1_p = jnp.zeros((K_PAD, hp), jnp.float32)
    w1_p = w1_p.at[:K_ONEHOT, :hidden].set(w_emb)
    w1_p = w1_p.at[K_LAST, :hidden].set(w1[NUM_DICE * EMBED_DIM])  # rolls-left
    w1_p = w1_p.at[K_ONE, :hidden].set(b1.reshape(hidden))         # bias b1

    w2_p = jnp.zeros((hp, OUT_DIM), jnp.float32).at[:hidden, :].set(w2)
    b2_p = b2.reshape(1, OUT_DIM).astype(jnp.float32)
    # TODO(synk): optionally cast w1_p/w2_p (and feat/h in-kernel) to bf16 for
    # 2-4x MXU rate; kept f32 since the kernel is writeback-bound, not MXU-bound.
    return dict(w1=w1_p, w2=w2_p, b2=b2_p)


def simple_net_forward(x, folded, *, max_tile_b=8192, flat_max_b=512):
    """x: (B, num_dice+1) int; returns (B, num_dice, 2) float32.

    B <= flat_max_b : flat grid-less VMEM-resident call (no pipeline overhead).
    B >  flat_max_b : gridded over the batch with >= 2 steps (so v7x's two
    TensorCores both get work) and a per-call tile of at most max_tile_b rows.
    Per-step VMEM use is <1 MiB, far below even v5e's 16 MiB scoped default.
    """
    B = x.shape[0]
    hp = folded["w1"].shape[1]
    x = x.astype(jnp.int32)
    args_w = (folded["w1"], folded["w2"], folded["b2"])

    if B <= flat_max_b:
        # Flat path: pad rows to a multiple of 8 only if needed (pad value 1
        # keeps the one-hot codes valid so padded rows are never garbage).
        b_pad = _round_up(max(B, 8), 8)
        x_p = x if b_pad == B else (
            jnp.ones((b_pad, X_COLS), jnp.int32).at[:B].set(x))
        out = pl.pallas_call(
            _mlp_kernel,
            out_shape=jax.ShapeDtypeStruct((b_pad, OUT_DIM), jnp.float32),
            in_specs=[pl.BlockSpec(memory_space=pltpu.MemorySpace.VMEM)] * 4,
            out_specs=pl.BlockSpec(memory_space=pltpu.MemorySpace.VMEM),
        )(x_p, *args_w)
    else:
        # Gridded path: at least 2 parallel steps, tile rows rounded to 128 so
        # padding waste stays small; weights use constant block indices.
        n_steps = max(2, pl.cdiv(B, max_tile_b))
        tile_b = _round_up(pl.cdiv(B, n_steps), TILE_ALIGN)
        b_pad = n_steps * tile_b
        x_p = x if b_pad == B else (
            jnp.ones((b_pad, X_COLS), jnp.int32).at[:B].set(x))
        out = pl.pallas_call(
            _mlp_kernel,
            out_shape=jax.ShapeDtypeStruct((b_pad, OUT_DIM), jnp.float32),
            grid=(n_steps,),
            in_specs=[
                pl.BlockSpec((tile_b, X_COLS), lambda i: (i, 0)),
                pl.BlockSpec((K_PAD, hp), lambda i: (0, 0)),
                pl.BlockSpec((hp, OUT_DIM), lambda i: (0, 0)),
                pl.BlockSpec((1, OUT_DIM), lambda i: (0, 0)),
            ],
            out_specs=pl.BlockSpec((tile_b, OUT_DIM), lambda i: (i, 0)),
            compiler_params=pltpu.CompilerParams(
                dimension_semantics=("parallel",)),
        )(x_p, *args_w)

    out = out if b_pad == B else out[:B]
    return out.reshape(B, NUM_DICE, 2)


def init_params(key, hidden_dim):
    """Deterministic synthetic parameters with the module's shapes."""
    k0, k1, k2, k3, k4 = jax.random.split(key, 5)
    embed = jax.random.normal(k0, (NUM_EMBED, EMBED_DIM), jnp.float32)
    lim1 = 1.0 / jnp.sqrt(IN_DIM)
    w1 = jax.random.uniform(k1, (IN_DIM, hidden_dim), jnp.float32, -lim1, lim1)
    b1 = jax.random.uniform(k2, (1, hidden_dim), jnp.float32, -lim1, lim1)
    lim2 = 1.0 / jnp.sqrt(hidden_dim)
    w2 = jax.random.uniform(k3, (hidden_dim, OUT_DIM), jnp.float32, -lim2, lim2)
    b2 = jax.random.uniform(k4, (1, OUT_DIM), jnp.float32, -lim2, lim2)
    return dict(embed=embed, w1=w1, b1=b1, w2=w2, b2=b2)


def reference_forward(x, params):
    """Pure-JAX reference mirroring the PyTorch module (for validation)."""
    B = x.shape[0]
    emb = jnp.take(params["embed"], x[:, :NUM_DICE] - 1, axis=0)
    flat = emb.reshape(B, NUM_DICE * EMBED_DIM)
    feat = jnp.concatenate([flat, x[:, NUM_DICE:].astype(jnp.float32)], axis=1)
    h = jnp.maximum(feat @ params["w1"] + params["b1"], 0.0)
    out = h @ params["w2"] + params["b2"]
    return out.reshape(B, NUM_DICE, 2)


if __name__ == "__main__":
    key = jax.random.PRNGKey(0)
    kp, kd1, kr1, kd2, kr2, kd3, kr3 = jax.random.split(key, 7)

    hidden_dim = 32
    params = init_params(kp, hidden_dim)
    folded = fold_params(params)        # one-time host-side weight folding

    # --- small batch: flat (grid-less) VMEM-resident path -------------------
    B1 = 8
    dice1 = jax.random.randint(kd1, (B1, NUM_DICE), 1, 7, dtype=jnp.int32)
    rolls1 = jax.random.randint(kr1, (B1, 1), 0, 3, dtype=jnp.int32)
    x1 = jnp.concatenate([dice1, rolls1], axis=1)
    out1 = jax.block_until_ready(simple_net_forward(x1, folded))
    assert out1.shape == (B1, NUM_DICE, 2)
    assert jnp.allclose(out1, reference_forward(x1, params), atol=1e-4, rtol=1e-4)

    # --- odd batch: flat path with row padding -------------------------------
    B3 = 5
    dice3 = jax.random.randint(kd3, (B3, NUM_DICE), 1, 7, dtype=jnp.int32)
    rolls3 = jax.random.randint(kr3, (B3, 1), 0, 3, dtype=jnp.int32)
    x3 = jnp.concatenate([dice3, rolls3], axis=1)
    out3 = jax.block_until_ready(simple_net_forward(x3, folded))
    assert out3.shape == (B3, NUM_DICE, 2)
    assert jnp.allclose(out3, reference_forward(x3, params), atol=1e-4, rtol=1e-4)

    # --- larger batch: gridded parallel-over-B path (small knobs to exercise it)
    B2 = 32
    dice2 = jax.random.randint(kd2, (B2, NUM_DICE), 1, 7, dtype=jnp.int32)
    rolls2 = jax.random.randint(kr2, (B2, 1), 0, 3, dtype=jnp.int32)
    x2 = jnp.concatenate([dice2, rolls2], axis=1)
    out2 = jax.block_until_ready(
        simple_net_forward(x2, folded, max_tile_b=16, flat_max_b=8))
    assert out2.shape == (B2, NUM_DICE, 2)
    assert jnp.allclose(out2, reference_forward(x2, params), atol=1e-4, rtol=1e-4)

    print("KERNEL_OK")
</pallas_src>

<mosaic_0001>
module attributes {stable_mosaic.version = 11 : i64} {
  func.func @_mlp_kernel(%arg0: memref<8x6xi32, #tpu.memory_space<vmem>>, %arg1: memref<32x128xf32, #tpu.memory_space<vmem>>, %arg2: memref<128x10xf32, #tpu.memory_space<vmem>>, %arg3: memref<1x10xf32, #tpu.memory_space<vmem>>, %arg4: memref<8x10xf32, #tpu.memory_space<vmem>>) attributes {dimension_semantics = [], scalar_prefetch = 0 : i64, scratch_operands = 0 : i64, tpu.core_type = #tpu.core_type<tc>} {
    %c0 = arith.constant 0 : index
    %c0_0 = arith.constant 0 : index
    %0 = vector.load %arg0[%c0, %c0_0] : memref<8x6xi32, #tpu.memory_space<vmem>>, vector<8x6xi32>
    %1 = vector.extract_strided_slice %0 {offsets = [0, 0], sizes = [8, 5], strides = [1, 1]} : vector<8x6xi32> to vector<8x5xi32>
    %2 = vector.extract_strided_slice %0 {offsets = [0, 5], sizes = [8, 1], strides = [1, 1]} : vector<8x6xi32> to vector<8x1xi32>
    %3 = arith.sitofp %2 : vector<8x1xi32> to vector<8x1xf32>
    %4 = tpu.iota {dimensions = array<i32: 1>} : vector<8x32xi32>
    %c30_i32 = arith.constant 30 : i32
    %5 = vector.broadcast %c30_i32 : i32 to vector<8x32xi32>
    %6 = arith.cmpi eq, %4, %5 : vector<8x32xi32>
    %cst = arith.constant 0.000000e+00 : f32
    %7 = vector.shape_cast %3 : vector<8x1xf32> to vector<8x1xf32>
    %8 = vector.broadcast %7 : vector<8x1xf32> to vector<8x32xf32>
    %9 = vector.broadcast %cst : f32 to vector<8x32xf32>
    %10 = arith.select %6, %8, %9 : vector<8x32xi1>, vector<8x32xf32>
    %c31_i32 = arith.constant 31 : i32
    %11 = vector.broadcast %c31_i32 : i32 to vector<8x32xi32>
    %12 = arith.cmpi eq, %4, %11 : vector<8x32xi32>
    %cst_1 = arith.constant 1.000000e+00 : f32
    %13 = vector.broadcast %cst_1 : f32 to vector<8x32xf32>
    %14 = arith.select %12, %13, %10 : vector<8x32xi1>, vector<8x32xf32>
    %15 = vector.extract_strided_slice %1 {offsets = [0, 0], sizes = [8, 1], strides = [1, 1]} : vector<8x5xi32> to vector<8x1xi32>
    %c1_i32 = arith.constant 1 : i32
    %16 = vector.broadcast %c1_i32 : i32 to vector<8x1xi32>
    %17 = arith.subi %15, %16 : vector<8x1xi32>
    %c0_i32 = arith.constant 0 : i32
    %18 = vector.broadcast %c0_i32 : i32 to vector<8x1xi32>
    %19 = arith.addi %17, %18 : vector<8x1xi32>
    %20 = vector.broadcast %19 : vector<8x1xi32> to vector<8x32xi32>
    %21 = arith.cmpi eq, %4, %20 : vector<8x32xi32>
    %22 = arith.extui %21 : vector<8x32xi1> to vector<8x32xi32>
    %23 = arith.sitofp %22 : vector<8x32xi32> to vector<8x32xf32>
    %24 = arith.addf %14, %23 : vector<8x32xf32>
    %25 = vector.extract_strided_slice %1 {offsets = [0, 1], sizes = [8, 1], strides = [1, 1]} : vector<8x5xi32> to vector<8x1xi32>
    %c1_i32_2 = arith.constant 1 : i32
    %26 = vector.broadcast %c1_i32_2 : i32 to vector<8x1xi32>
    %27 = arith.subi %25, %26 : vector<8x1xi32>
    %c6_i32 = arith.constant 6 : i32
    %28 = vector.broadcast %c6_i32 : i32 to vector<8x1xi32>
    %29 = arith.addi %27, %28 : vector<8x1xi32>
    %30 = vector.broadcast %29 : vector<8x1xi32> to vector<8x32xi32>
    %31 = arith.cmpi eq, %4, %30 : vector<8x32xi32>
    %32 = arith.extui %31 : vector<8x32xi1> to vector<8x32xi32>
    %33 = arith.sitofp %32 : vector<8x32xi32> to vector<8x32xf32>
    %34 = arith.addf %24, %33 : vector<8x32xf32>
    %35 = vector.extract_strided_slice %1 {offsets = [0, 2], sizes = [8, 1], strides = [1, 1]} : vector<8x5xi32> to vector<8x1xi32>
    %c1_i32_3 = arith.constant 1 : i32
    %36 = vector.broadcast %c1_i32_3 : i32 to vector<8x1xi32>
    %37 = arith.subi %35, %36 : vector<8x1xi32>
    %c12_i32 = arith.constant 12 : i32
    %38 = vector.broadcast %c12_i32 : i32 to vector<8x1xi32>
    %39 = arith.addi %37, %38 : vector<8x1xi32>
    %40 = vector.broadcast %39 : vector<8x1xi32> to vector<8x32xi32>
    %41 = arith.cmpi eq, %4, %40 : vector<8x32xi32>
    %42 = arith.extui %41 : vector<8x32xi1> to vector<8x32xi32>
    %43 = arith.sitofp %42 : vector<8x32xi32> to vector<8x32xf32>
    %44 = arith.addf %34, %43 : vector<8x32xf32>
    %45 = vector.extract_strided_slice %1 {offsets = [0, 3], sizes = [8, 1], strides = [1, 1]} : vector<8x5xi32> to vector<8x1xi32>
    %c1_i32_4 = arith.constant 1 : i32
    %46 = vector.broadcast %c1_i32_4 : i32 to vector<8x1xi32>
    %47 = arith.subi %45, %46 : vector<8x1xi32>
    %c18_i32 = arith.constant 18 : i32
    %48 = vector.broadcast %c18_i32 : i32 to vector<8x1xi32>
    %49 = arith.addi %47, %48 : vector<8x1xi32>
    %50 = vector.broadcast %49 : vector<8x1xi32> to vector<8x32xi32>
    %51 = arith.cmpi eq, %4, %50 : vector<8x32xi32>
    %52 = arith.extui %51 : vector<8x32xi1> to vector<8x32xi32>
    %53 = arith.sitofp %52 : vector<8x32xi32> to vector<8x32xf32>
    %54 = arith.addf %44, %53 : vector<8x32xf32>
    %55 = vector.extract_strided_slice %1 {offsets = [0, 4], sizes = [8, 1], strides = [1, 1]} : vector<8x5xi32> to vector<8x1xi32>
    %c1_i32_5 = arith.constant 1 : i32
    %56 = vector.broadcast %c1_i32_5 : i32 to vector<8x1xi32>
    %57 = arith.subi %55, %56 : vector<8x1xi32>
    %c24_i32 = arith.constant 24 : i32
    %58 = vector.broadcast %c24_i32 : i32 to vector<8x1xi32>
    %59 = arith.addi %57, %58 : vector<8x1xi32>
    %60 = vector.broadcast %59 : vector<8x1xi32> to vector<8x32xi32>
    %61 = arith.cmpi eq, %4, %60 : vector<8x32xi32>
    %62 = arith.extui %61 : vector<8x32xi1> to vector<8x32xi32>
    %63 = arith.sitofp %62 : vector<8x32xi32> to vector<8x32xf32>
    %64 = arith.addf %54, %63 : vector<8x32xf32>
    %c0_6 = arith.constant 0 : index
    %c0_7 = arith.constant 0 : index
    %65 = vector.load %arg1[%c0_6, %c0_7] : memref<32x128xf32, #tpu.memory_space<vmem>>, vector<32x128xf32>
    %cst_8 = arith.constant dense<0.000000e+00> : vector<8x128xf32>
    %66 = tpu.matmul %64, %65, %cst_8 {dimension_numbers = #tpu.dot_dimension_numbers<[1], [0], [0], [1], [0, 0, 1, 1], [], []>} : vector<8x32xf32>, vector<32x128xf32>, vector<8x128xf32> -> vector<8x128xf32>
    %cst_9 = arith.constant 0.000000e+00 : f32
    %67 = vector.broadcast %cst_9 : f32 to vector<8x128xf32>
    %68 = arith.maximumf %66, %67 : vector<8x128xf32>
    %c0_10 = arith.constant 0 : index
    %c0_11 = arith.constant 0 : index
    %69 = vector.load %arg2[%c0_10, %c0_11] : memref<128x10xf32, #tpu.memory_space<vmem>>, vector<128x10xf32>
    %cst_12 = arith.constant dense<0.000000e+00> : vector<8x10xf32>
    %70 = tpu.matmul %68, %69, %cst_12 {dimension_numbers = #tpu.dot_dimension_numbers<[1], [0], [0], [1], [0, 0, 1, 1], [], []>} : vector<8x128xf32>, vector<128x10xf32>, vector<8x10xf32> -> vector<8x10xf32>
    %c0_13 = arith.constant 0 : index
    %c0_14 = arith.constant 0 : index
    %71 = vector.load %arg3[%c0_13, %c0_14] : memref<1x10xf32, #tpu.memory_space<vmem>>, vector<1x10xf32>
    %72 = vector.broadcast %71 : vector<1x10xf32> to vector<8x10xf32>
    %73 = arith.addf %70, %72 : vector<8x10xf32>
    %c0_15 = arith.constant 0 : index
    %c0_16 = arith.constant 0 : index
    %74 = vector.load %arg4[%c0_15, %c0_16] : memref<8x10xf32, #tpu.memory_space<vmem>>, vector<8x10xf32>
    tpu.vector_store %arg4[%c0_15, %c0_16], %73 {strides = array<i32>} : memref<8x10xf32, #tpu.memory_space<vmem>>, vector<8x10xf32>,
    return
  }
}

</mosaic_0001>

<bundles_post_ra>
// kernel: tpu_custom_call.1
= control target key start
LH: loop header
LB: loop body
LE: loop exit
PB: predicated region body
PF: predicated region fallthrough
CT: control target
= control target key end

     0   :  { %v372_v1 = vmov 5   ;;  %v373_v4 = vmov 1   ;;  %s502_s0 = inlined_call_operand.vmem [shape: s32[8,6], index: 0, kind: input, shape index: {}]   ;;  %s503_s1 = inlined_call_operand.vmem [shape: f32[32,128], index: 1, kind: input, shape index: {}]   ;;  %s504_s2 = inlined_call_operand.vmem [shape: f32[128,10], index: 2, kind: input, shape index: {}]   ;;  %s505_s3 = inlined_call_operand.vmem [shape: f32[1,10], index: 3, kind: input, shape index: {}]   ;;  %s506_s4 = inlined_call_operand.hbm [shape: f32[8,10], index: 4, kind: output, shape index: {}]  }
   0x1   :  { %v18_v0 = vld [vmem:[%s502_s0] sm:$0xff]  ;;  %344 = vset.pattern.permute.xlu0 %v372_v1  ;;  %346 = vset.pattern.permute.xlu1 %v373_v4 }
   0x2   :  { %v19_v2 = vcvt.s32.f32 %v18_v0  ;;  %v259_v3 = vadd.s32 4294967295, %v18_v0 }
   0x3   :  { %9 = vsyncpa [#allocation3], 0  ;;  %v374_v6 = vmov 0.0   ;;  %v375_v8 = vmov 0   ;;  %v376_v9 = vmov 2   ;;  %v74_v11 = vld [vmem:[%s503_s1 + $0x18] sm:$0xff]  ;;  %v20_v32 = vlaneseq }
   0x4   :  { %25 = vperm.xlu0 %344, %v19_v2   ;;  %v39_v5 = vadd.s32 6, %v259_v3  ;;  %289 = vmatprep.subr.mxu0 %v374_v6  ;;  %v47_v7 = vadd.s32 12, %v259_v3  ;;  %v63_v10 = vadd.s32 24, %v259_v3  ;;  %v55_v12 = vadd.s32 18, %v259_v3  ;;  %v73_v13 = vld [vmem:[%s503_s1 + $0x10] sm:$0xff]  ;;  %v72_v15 = vld [vmem:[%s503_s1 + $0x8] sm:$0xff] }
   0x5   :  { %300 = vmatprep.subr.mxu1 %v374_v6  ;;  %290 = vmatpush3.msra.mxu0 %v74_v11  ;;  %v377_v14 = vmov 4   ;;  %v378_v16 = vmov 3   ;;  %v71_v17 = vld [vmem:[%s503_s1] sm:$0xff]  ;;  %vm379_vm0 = vmmov 0   ;;  %v165_v18 = vld [vmem:[%s504_s2 + $0x78] sm:$0xff]  ;;  %v164_v19 = vld [vmem:[%s504_s2 + $0x70] sm:$0xff] }
   0x6   :  { %41 = vperm.xlu1 %346, %v39_v5   ;;  %291 = vmatprep.subr.mxu0 %v374_v6  ;;  %v163_v20 = vld [vmem:[%s504_s2 + $0x68] sm:$0xff]  ;;  %v162_v21 = vld [vmem:[%s504_s2 + $0x60] sm:$0xff]  ;;  %v161_v22 = vld [vmem:[%s504_s2 + $0x58] sm:$0xff]  ;;  %v21_v33 = vand.u32 127, %v20_v32  ;;  %vm75_vm8 = vcmask 261120   ;;  %s380_s1 = smov [#allocation2]  }
   0x7   :  { %292 = vmatpush3.msra.mxu0 %v73_v13  ;;  %297 = vmatprep.mubr.msk.f32.mxu0 %vm379_vm0, %v374_v6  ;;  %v160_v23 = vld [vmem:[%s504_s2 + $0x50] sm:$0xff]  ;;  %v159_v24 = vld [vmem:[%s504_s2 + $0x48] sm:$0xff]  ;;  %v158_v25 = vld [vmem:[%s504_s2 + $0x40] sm:$0xff]  ;;  %s251_s30 = sshll.u32 %s380_s1, 4  ;;  %vm243_vm9 = vcmask 80896   ;;  %s252_s30 = int_to_ptr.vmem [resolvable:$true] %s251_s30 }
   0x8   :  { %345 = vset.pattern.permute.xlu0 %v375_v8  ;;  %293 = vmatprep.subr.mxu0 %v374_v6  ;;  %v157_v26 = vld [vmem:[%s504_s2 + $0x38] sm:$0xff]  ;;  %v156_v27 = vld [vmem:[%s504_s2 + $0x30] sm:$0xff]  ;;  %v155_v28 = vld [vmem:[%s504_s2 + $0x28] sm:$0xff]  ;;  %vm22_vm1 = vcmp.eq.s32.totalorder %v21_v33, 30  ;;  %vm29_vm2 = vcmp.eq.s32.totalorder %v21_v33, 31  ;;  %s350_s5 = scalar_lea.vmem %s252_s30, 128  ;;  %p355_p1 = scmp.lt.s32.totalorder %s252_s30, %s252_s30 }
   0x9   :  { %33 = vperm.xlu0 %345, %v259_v3   ;;  %294 = vmatpush3.msra.mxu0 %v72_v15  ;;  %v154_v29 = vld [vmem:[%s504_s2 + $0x20] sm:$0xff]  ;;  %v153_v30 = vld [vmem:[%s504_s2 + $0x18] sm:$0xff]  ;;  %v152_v31 = vld [vmem:[%s504_s2 + $0x10] sm:$0xff]  ;;  %p351_p0 = scmp.ne.s32.totalorder %s252_s30, %s350_s5  ;;  %p356_p2 = scmp.lt.s32.totalorder %s350_s5, %s350_s5 }
   0xa   :  { %347 = vset.pattern.permute.xlu1 %v376_v9  ;;  %295 = vmatprep.subr.mxu0 %v374_v6  ;;  %v151_v52 = vld [vmem:[%s504_s2 + $0x8] sm:$0xff]  ;;  %v150_v53 = vld [vmem:[%s504_s2] sm:$0xff] }
   0xb   :  { %49 = vperm.xlu1 %347, %v47_v7   ;;  %296 = vmatpush3.msra.mxu0 %v71_v17  ;;  %v266_v57 = vld [vmem:[%s505_s3] ss:$0 sm:$0xff]  ;;  %p357_p3 = por %p356_p2, %p355_p1 }
   0xc   :  { %332 = vmatprep.mubr.msk.f32.mxu1 %vm379_vm0, %v374_v6  ;;  %301 = vmatpush3.msra.mxu1 %v165_v18 }
   0xd   :  { %349 = vset.pattern.permute.xlu0 %v377_v14  ;;  %302 = vmatprep.subr.mxu1 %v374_v6  ;;  %p358_p4 = pnand %p357_p3, %p351_p0 }
   0xe   :  { %65 = vperm.xlu0 %349, %v63_v10   ;;  %303 = vmatpush3.msra.mxu1 %v164_v19 }
   0xf   :  { %348 = vset.pattern.permute.xlu1 %v378_v16  ;;  %304 = vmatprep.subr.mxu1 %v374_v6 }
  0x10   :  { %57 = vperm.xlu1 %348, %v55_v12   ;;  %305 = vmatpush3.msra.mxu1 %v163_v20 }
  0x11   :  { %306 = vmatprep.subr.mxu1 %v374_v6 }
  0x12   :  { %307 = vmatpush3.msra.mxu1 %v162_v21 }
  0x13   :  { %308 = vmatprep.subr.mxu1 %v374_v6 }
  0x14   :  { %309 = vmatpush3.msra.mxu1 %v161_v22 }
  0x15   :  { %310 = vmatprep.subr.mxu1 %v374_v6 }
  0x16   :  { %311 = vmatpush3.msra.mxu1 %v160_v23 }
  0x17   :  { %312 = vmatprep.subr.mxu1 %v374_v6 }
  0x18   :  { %313 = vmatpush3.msra.mxu1 %v159_v24 }
  0x19   :  { %314 = vmatprep.subr.mxu1 %v374_v6 }
  0x1a   :  { %315 = vmatpush3.msra.mxu1 %v158_v25 }
  0x1b   :  { %316 = vmatprep.subr.mxu1 %v374_v6 }
  0x1c   :  { %317 = vmatpush3.msra.mxu1 %v157_v26 }
  0x1d   :  { %318 = vmatprep.subr.mxu1 %v374_v6 }
  0x1e   :  { %319 = vmatpush3.msra.mxu1 %v156_v27 }
  0x1f   :  { %320 = vmatprep.subr.mxu1 %v374_v6 }
  0x20   :  { %321 = vmatpush3.msra.mxu1 %v155_v28 }
  0x21   :  { %322 = vmatprep.subr.mxu1 %v374_v6 }
  0x22   :  { %323 = vmatpush3.msra.mxu1 %v154_v29 }
  0x23   :  { %324 = vmatprep.subr.mxu1 %v374_v6 }
  0x24   :  { %325 = vmatpush3.msra.mxu1 %v153_v30 }
  0x25   :  { %326 = vmatprep.subr.mxu1 %v374_v6 }
  0x26   :  { %327 = vmatpush3.msra.mxu1 %v152_v31 }
  0x27   :  { %328 = vmatprep.subr.mxu1 %v374_v6 }
  0x28   :  { %329 = vmatpush3.msra.mxu1 %v151_v52 }
  0x29   :  { %330 = vmatprep.subr.mxu1 %v374_v6 }
  0x2a   :  { %331 = vmatpush3.msra.mxu1 %v150_v53 }
  0x7f   :  { %v26_v34 = vpop.permute.xlu0 %25 }
  0x80   :  { %v28_v36 = vsel %vm22_vm1, %v26_v34, 0.0 }
  0x81   :  { %v42_v35 = vpop.permute.xlu1 %41  ;;  %v30_v38 = vsel %vm29_vm2, 1.0, %v28_v36 }
  0x82   :  { %vm43_vm3 = vcmp.eq.s32.totalorder %v21_v33, %v42_v35 }
  0x83   :  { %v261_v42 = vsel %vm43_vm3, 1.0, %v374_v6 }
  0x84   :  { %v34_v37 = vpop.permute.xlu0 %33 }
  0x85   :  { %vm35_vm4 = vcmp.eq.s32.totalorder %v21_v33, %v34_v37 }
  0x86   :  { %v260_v39 = vsel %vm35_vm4, 1.0, %v374_v6  ;;  %v50_v40 = vpop.permute.xlu1 %49 }
  0x87   :  { %v38_v41 = vadd.f32 %v260_v39, %v30_v38  ;;  %vm51_vm5 = vcmp.eq.s32.totalorder %v21_v33, %v50_v40 }
  0x88   :  { %v262_v45 = vsel %vm51_vm5, 1.0, %v374_v6 }
  0x89   :  { %v46_v43 = vadd.f32 %v261_v42, %v38_v41  ;;  %v66_v44 = vpop.permute.xlu0 %65 }
  0x8a   :  { %vm67_vm6 = vcmp.eq.s32.totalorder %v21_v33, %v66_v44 }
  0x8b   :  { %v54_v46 = vadd.f32 %v262_v45, %v46_v43  ;;  %v58_v47 = vpop.permute.xlu1 %57  ;;  %v264_v49 = vsel %vm67_vm6, 1.0, %v374_v6 }
  0x8c   :  { %vm59_vm7 = vcmp.eq.s32.totalorder %v21_v33, %v58_v47 }
  0x8d   :  { %v263_v48 = vsel %vm59_vm7, 1.0, %v374_v6 }
  0x8e   :  { %v62_v50 = vadd.f32 %v263_v48, %v54_v46 }
  0x90   :  { %v70_v51 = vadd.f32 %v264_v49, %v62_v50 }
  0x92   :  { %298 = vmatmul.mubr.msk.f32.vlgmr.msra.gmra.mxu0 %vm75_vm8, %v70_v51 }
 0x152   :  { %v145_v54 = vpop.f32.mrf.mxu0 }
 0x153   :  { %v149_v55 = vmax.f32 %v145_v54, 0.0 }
 0x154   :  { %v299_v56 = vpop.f32.mrf.mxu0 }
 0x155   :  { %333 = vmatmul.mubr.f32.vlgmr.msra.gmra.mxu1 %v149_v55 }
 0x215   :  { %v239_v58 = vpop.f32.mrf.mxu1 }
 0x216   :  { %v240_v59 = vadd.f32 %v266_v57, %v239_v58 }
 0x217   :  { %v334_v60 = vpop.f32.mrf.mxu1 }
 0x218   :  { %244 = vst.msk [vmem:[#allocation2] sm:$0xff] %vm243_vm9, %v240_v59 }
 0x219   :  { %361 = shalt.err (!%p358_p4)
}
 0x21a   :  { %254 = dma.vmem_to_hbm [thread:$0]  %s252_s30, 128, %s506_s4, [#allocation3]  }
 0x21b   :  { %370 = dma.done.wait [#allocation3], 128  }
 0x21c   :  { %371 = vsyncadd [#allocation3], 4294967168 }
 0x21d   :  { %258 = vsyncpa [#allocation3], 1 }

</bundles_post_ra>
